<compile_context>
chip_gen: v7x
topology: tpu7x:2x2x1
jax: 0.10.0
libtpu: 0.0.40
codegen_flags: <defaults>
</compile_context>

<pallas_src>
import jax
import jax.numpy as jnp
from jax.experimental import pallas as pl
from jax.experimental.pallas import tpu as pltpu


def _group_schema_kernel(x_ref, w_ref, b_ref, out_ref, acc_ref):
    v = pl.program_id(1)
    k = pl.program_id(2)
    nv = pl.num_programs(1)
    nk = pl.num_programs(2)

    # Zero the resident (tn, V) score block once per N-tile so the masked
    # column writes below never read uninitialized VMEM.
    @pl.when(jnp.logical_and(v == 0, k == 0))
    def _():
        out_ref[...] = jnp.zeros_like(out_ref)

    @pl.when(k == 0)
    def _():
        acc_ref[...] = jnp.zeros_like(acc_ref)

    # Fused 1x1-conv + fc as a single MXU matvec over the K = C*H*W axis.
    # x_ref: (tn, tk), w_ref: (1, tk); contract the lane axis of both.
    acc_ref[...] += jax.lax.dot_general(
        x_ref[...], w_ref[...],
        dimension_numbers=(((1,), (1,)), ((), ())),
        preferred_element_type=jnp.float32)                          # (tn, 1)

    @pl.when(k == nk - 1)
    def _():
        y = acc_ref[...] + b_ref[0, 0]                               # (tn, 1)
        y = jax.nn.sigmoid(jnp.log(jnp.abs(y)))
        # Write this view's score into column v of the resident (tn, V) block.
        tn, nviews = out_ref.shape
        col = jax.lax.broadcasted_iota(jnp.int32, (tn, nviews), 1)
        out_ref[...] = jnp.where(col == v, y, out_ref[...])

    @pl.when(jnp.logical_and(v == nv - 1, k == nk - 1))
    def _():
        s = out_ref[...]                                             # (tn, V)
        m = jnp.max(s, axis=1, keepdims=True)
        e = jnp.exp(s - m)
        out_ref[...] = e / jnp.sum(e, axis=1, keepdims=True)


def _pick_tile(total, target, quantum):
    """Largest multiple of `quantum` that divides `total` and is <= target.

    Callers pad `total` to a multiple of `quantum` first (or have
    total <= target), so this always returns a legal, VMEM-sized block and
    never silently falls back to a huge full extent."""
    if total <= target:
        return total
    t = (max(target, quantum) // quantum) * quantum
    while t > quantum and total % t:
        t -= quantum
    return t


def group_schema(raw_view, conv_w, conv_b, fc_w, fc_b, *,
                 max_tn=512, max_tk=8192, vmem_limit_bytes=48 << 20):
    """raw_view: [V, N, C, H, W] -> softmaxed view scores [N, V] (float32)."""
    V, N, C, H, W = raw_view.shape
    K = C * H * W

    # FREE reshape (layout-preserving) — no transpose of the big activation
    # tensor.  The (c, h*W + w) flatten order is absorbed into w_fused below.
    x = raw_view.reshape(V, N, K)

    # Fold conv (over C) and fc (over H*W) into one K-length weight + scalar
    # bias, in the same (c, hw) order as the reshape above.
    w_fused = (conv_w[:, None] * fc_w[None, :]).reshape(1, K).astype(x.dtype)
    b_fused = (conv_b[0] * jnp.sum(fc_w) + fc_b[0]).astype(jnp.float32).reshape(1, 1)

    # Pad N / K to hardware quanta only when needed (zero K-padding does not
    # change the contraction; padded N rows are sliced off at the end).
    sub = 8 if x.dtype == jnp.float32 else 16
    pad_n = (-N) % sub
    pad_k = (-K) % 128
    if pad_n or pad_k:
        x = jnp.pad(x, ((0, 0), (0, pad_n), (0, pad_k)))
    if pad_k:
        w_fused = jnp.pad(w_fused, ((0, 0), (0, pad_k)))
    Np, Kp = N + pad_n, K + pad_k

    # Batch tile: cap so the "parallel" N axis has >= 2 blocks when possible
    # (v7x has 2 TensorCores; harmless on single-TC v5e/v6e).
    tn_target = min(max_tn, (Np // 2 // sub) * sub) if Np >= 2 * sub else Np
    tn = _pick_tile(Np, max(tn_target, sub), sub)
    tk = _pick_tile(Kp, max_tk, 128)
    grid = (Np // tn, V, Kp // tk)

    out = pl.pallas_call(
        _group_schema_kernel,
        out_shape=jax.ShapeDtypeStruct((Np, V), jnp.float32),
        grid_spec=pltpu.PrefetchScalarGridSpec(
            num_scalar_prefetch=0,
            grid=grid,
            in_specs=[
                pl.BlockSpec((pl.Squeezed(), tn, tk), lambda n, v, k: (v, n, k)),
                pl.BlockSpec((1, tk), lambda n, v, k: (0, k)),
                pl.BlockSpec(memory_space=pltpu.MemorySpace.SMEM),
            ],
            out_specs=pl.BlockSpec((tn, V), lambda n, v, k: (n, 0)),
            scratch_shapes=[pltpu.VMEM((tn, 1), jnp.float32)],
        ),
        compiler_params=pltpu.CompilerParams(
            dimension_semantics=("parallel", "arbitrary", "arbitrary"),
            vmem_limit_bytes=vmem_limit_bytes),
    )(x, w_fused, b_fused)

    return out[:N] if pad_n else out


if __name__ == "__main__":
    # Small stand-ins for the module's real sizes (C=192, H=W=52).
    V, N, C, H, W = 3, 8, 8, 8, 8
    key = jax.random.PRNGKey(0)
    k1, k2, k3, k4, k5 = jax.random.split(key, 5)

    raw_view = jax.random.normal(k1, (V, N, C, H, W), jnp.float32)   # [V N C H W]

    # Parameters implied by OneConvFc.__init__:
    #   Conv2d(C, 1, kernel=1) -> weight (C,), bias (1,)
    #   Linear(H*W, 1)         -> weight (H*W,), bias (1,)
    conv_w = 0.1 * jax.random.normal(k2, (C,), jnp.float32)
    conv_b = 0.1 * jax.random.normal(k3, (1,), jnp.float32)
    fc_w = 0.1 * jax.random.normal(k4, (H * W,), jnp.float32)
    fc_b = 0.1 * jax.random.normal(k5, (1,), jnp.float32)

    out = jax.block_until_ready(
        group_schema(raw_view, conv_w, conv_b, fc_w, fc_b))

    # Pure-JAX reference mirroring the PyTorch module (conv then fc).
    def reference(raw):
        conv = jnp.einsum("vnchw,c->vnhw", raw, conv_w) + conv_b[0]
        y = jnp.einsum("vnh,h->vn", conv.reshape(V, N, H * W), fc_w) + fc_b[0]
        y = jax.nn.sigmoid(jnp.log(jnp.abs(y)))          # (V, N)
        return jax.nn.softmax(y.T, axis=1)               # (N, V)

    expected = reference(raw_view)
    assert out.shape == (N, V)
    # Tolerance allows for the different summation order of the fused MXU
    # matvec vs. the staged conv-then-fc reference (do not tighten: log|y|
    # is sensitive when y is near zero).
    assert jnp.allclose(out, expected, atol=1e-4, rtol=1e-4), (out, expected)
    print("KERNEL_OK")
</pallas_src>

<mosaic_0001>
module attributes {stable_mosaic.version = 11 : i64} {
  func.func @_group_schema_kernel(%arg0: i32, %arg1: i32, %arg2: i32, %arg3: memref<1x8x512xf32, #tpu.memory_space<vmem>>, %arg4: memref<1x512xf32, #tpu.memory_space<vmem>>, %arg5: memref<1x1xf32, #tpu.memory_space<smem>>, %arg6: memref<8x3xf32, #tpu.memory_space<vmem>>, %arg7: memref<8x1xf32, #tpu.memory_space<vmem>>) attributes {dimension_semantics = [#tpu.dimension_semantics<parallel>, #tpu.dimension_semantics<arbitrary>, #tpu.dimension_semantics<arbitrary>], iteration_bounds = array<i64: 1, 3, 1>, scalar_prefetch = 0 : i64, scratch_operands = 1 : i64, tpu.core_type = #tpu.core_type<tc>, window_params = [{transform_indices = @transform_0, window_bounds = array<i64: 1, 8, 512>}, {transform_indices = @transform_1, window_bounds = array<i64: 1, 512>}, {transform_indices = @transform_2, window_bounds = array<i64: 1, 1>}, {transform_indices = @transform_3, window_bounds = array<i64: 8, 3>}]} {
    %c0_i32 = arith.constant 0 : i32
    %0 = arith.cmpi eq, %arg1, %c0_i32 : i32
    %c0_i32_0 = arith.constant 0 : i32
    %1 = arith.cmpi eq, %arg2, %c0_i32_0 : i32
    %2 = arith.andi %0, %1 : i1
    %3 = arith.extui %2 : i1 to i32
    %c0_i32_1 = arith.constant 0 : i32
    %4 = arith.cmpi ne, %3, %c0_i32_1 : i32
    scf.if %4 {
      %cst_16 = arith.constant 0.000000e+00 : f32
      %23 = vector.broadcast %cst_16 : f32 to vector<8x3xf32>
      %c0_17 = arith.constant 0 : index
      %c0_18 = arith.constant 0 : index
      %24 = vector.load %arg6[%c0_17, %c0_18] : memref<8x3xf32, #tpu.memory_space<vmem>>, vector<8x3xf32>
      tpu.vector_store %arg6[%c0_17, %c0_18], %23 {strides = array<i32>} : memref<8x3xf32, #tpu.memory_space<vmem>>, vector<8x3xf32>,
    } else {
    }
    %c0_i32_2 = arith.constant 0 : i32
    %5 = arith.cmpi eq, %arg2, %c0_i32_2 : i32
    %6 = arith.extui %5 : i1 to i32
    %c0_i32_3 = arith.constant 0 : i32
    %7 = arith.cmpi ne, %6, %c0_i32_3 : i32
    scf.if %7 {
      %cst_16 = arith.constant 0.000000e+00 : f32
      %23 = vector.broadcast %cst_16 : f32 to vector<8x1xf32>
      %c0_17 = arith.constant 0 : index
      %c0_18 = arith.constant 0 : index
      %24 = vector.load %arg7[%c0_17, %c0_18] : memref<8x1xf32, #tpu.memory_space<vmem>>, vector<8x1xf32>
      tpu.vector_store %arg7[%c0_17, %c0_18], %23 {strides = array<i32>} : memref<8x1xf32, #tpu.memory_space<vmem>>, vector<8x1xf32>,
    } else {
    }
    %c0 = arith.constant 0 : index
    %c0_4 = arith.constant 0 : index
    %8 = vector.load %arg7[%c0, %c0_4] : memref<8x1xf32, #tpu.memory_space<vmem>>, vector<8x1xf32>
    %c0_5 = arith.constant 0 : index
    %c0_6 = arith.constant 0 : index
    %c0_7 = arith.constant 0 : index
    %9 = vector.load %arg3[%c0_5, %c0_6, %c0_7] : memref<1x8x512xf32, #tpu.memory_space<vmem>>, vector<1x8x512xf32>
    %10 = vector.shape_cast %9 : vector<1x8x512xf32> to vector<8x512xf32>
    %c0_8 = arith.constant 0 : index
    %c0_9 = arith.constant 0 : index
    %11 = vector.load %arg4[%c0_8, %c0_9] : memref<1x512xf32, #tpu.memory_space<vmem>>, vector<1x512xf32>
    %cst = arith.constant dense<0.000000e+00> : vector<8x1xf32>
    %12 = tpu.matmul %10, %11, %cst {dimension_numbers = #tpu.dot_dimension_numbers<[1], [1], [0], [0], [0, 0, 1, 0], [], []>} : vector<8x512xf32>, vector<1x512xf32>, vector<8x1xf32> -> vector<8x1xf32>
    %13 = arith.addf %8, %12 : vector<8x1xf32>
    %c0_10 = arith.constant 0 : index
    %c0_11 = arith.constant 0 : index
    %14 = vector.load %arg7[%c0_10, %c0_11] : memref<8x1xf32, #tpu.memory_space<vmem>>, vector<8x1xf32>
    tpu.vector_store %arg7[%c0_10, %c0_11], %13 {strides = array<i32>} : memref<8x1xf32, #tpu.memory_space<vmem>>, vector<8x1xf32>,
    %c0_i32_12 = arith.constant 0 : i32
    %15 = arith.cmpi eq, %arg2, %c0_i32_12 : i32
    %16 = arith.extui %15 : i1 to i32
    %c0_i32_13 = arith.constant 0 : i32
    %17 = arith.cmpi ne, %16, %c0_i32_13 : i32
    scf.if %17 {
      %c0_16 = arith.constant 0 : index
      %c0_17 = arith.constant 0 : index
      %23 = vector.load %arg7[%c0_16, %c0_17] : memref<8x1xf32, #tpu.memory_space<vmem>>, vector<8x1xf32>
      %c0_18 = arith.constant 0 : index
      %c0_19 = arith.constant 0 : index
      %24 = memref.load %arg5[%c0_18, %c0_19] : memref<1x1xf32, #tpu.memory_space<smem>>
      %25 = vector.broadcast %24 : f32 to vector<8x1xf32>
      %26 = arith.addf %23, %25 : vector<8x1xf32>
      %27 = math.absf %26 : vector<8x1xf32>
      %28 = math.log %27 : vector<8x1xf32>
      %29 = arith.negf %28 : vector<8x1xf32>
      %30 = math.exp %29 : vector<8x1xf32>
      %cst_20 = arith.constant 1.000000e+00 : f32
      %31 = vector.broadcast %cst_20 : f32 to vector<8x1xf32>
      %32 = arith.addf %31, %30 : vector<8x1xf32>
      %33 = arith.divf %31, %32 : vector<8x1xf32>
      %34 = tpu.iota {dimensions = array<i32: 1>} : vector<8x3xi32>
      %35 = vector.broadcast %arg1 : i32 to vector<8x3xi32>
      %36 = arith.cmpi eq, %34, %35 : vector<8x3xi32>
      %c0_21 = arith.constant 0 : index
      %c0_22 = arith.constant 0 : index
      %37 = vector.load %arg6[%c0_21, %c0_22] : memref<8x3xf32, #tpu.memory_space<vmem>>, vector<8x3xf32>
      %38 = vector.shape_cast %33 : vector<8x1xf32> to vector<8x1xf32>
      %39 = vector.broadcast %38 : vector<8x1xf32> to vector<8x3xf32>
      %40 = arith.select %36, %39, %37 : vector<8x3xi1>, vector<8x3xf32>
      %c0_23 = arith.constant 0 : index
      %c0_24 = arith.constant 0 : index
      %41 = vector.load %arg6[%c0_23, %c0_24] : memref<8x3xf32, #tpu.memory_space<vmem>>, vector<8x3xf32>
      tpu.vector_store %arg6[%c0_23, %c0_24], %40 {strides = array<i32>} : memref<8x3xf32, #tpu.memory_space<vmem>>, vector<8x3xf32>,
    } else {
    }
    %c2_i32 = arith.constant 2 : i32
    %18 = arith.cmpi eq, %arg1, %c2_i32 : i32
    %c0_i32_14 = arith.constant 0 : i32
    %19 = arith.cmpi eq, %arg2, %c0_i32_14 : i32
    %20 = arith.andi %18, %19 : i1
    %21 = arith.extui %20 : i1 to i32
    %c0_i32_15 = arith.constant 0 : i32
    %22 = arith.cmpi ne, %21, %c0_i32_15 : i32
    scf.if %22 {
      %c0_16 = arith.constant 0 : index
      %c0_17 = arith.constant 0 : index
      %23 = vector.load %arg6[%c0_16, %c0_17] : memref<8x3xf32, #tpu.memory_space<vmem>>, vector<8x3xf32>
      %cst_18 = arith.constant dense<0xFF800000> : vector<8xf32>
      %24 = vector.multi_reduction <maximumf>, %23, %cst_18 [1] : vector<8x3xf32> to vector<8xf32>
      %25 = vector.shape_cast %24 : vector<8xf32> to vector<8x1xf32>
      %26 = vector.broadcast %25 : vector<8x1xf32> to vector<8x3xf32>
      %27 = arith.subf %23, %26 : vector<8x3xf32>
      %28 = math.exp %27 : vector<8x3xf32>
      %cst_19 = arith.constant dense<0.000000e+00> : vector<8xf32>
      %29 = vector.multi_reduction <add>, %28, %cst_19 [1] : vector<8x3xf32> to vector<8xf32>
      %30 = vector.shape_cast %29 : vector<8xf32> to vector<8x1xf32>
      %31 = vector.broadcast %30 : vector<8x1xf32> to vector<8x3xf32>
      %32 = arith.divf %28, %31 : vector<8x3xf32>
      %c0_20 = arith.constant 0 : index
      %c0_21 = arith.constant 0 : index
      %33 = vector.load %arg6[%c0_20, %c0_21] : memref<8x3xf32, #tpu.memory_space<vmem>>, vector<8x3xf32>
      tpu.vector_store %arg6[%c0_20, %c0_21], %32 {strides = array<i32>} : memref<8x3xf32, #tpu.memory_space<vmem>>, vector<8x3xf32>,
    } else {
    }
    return
  }
  func.func @transform_0(%arg0: i32, %arg1: i32, %arg2: i32) -> (i32, i32, i32) {
    %c0_i32 = arith.constant 0 : i32
    return %arg1, %arg0, %arg2 : i32, i32, i32
  }
  func.func @transform_1(%arg0: i32, %arg1: i32, %arg2: i32) -> (i32, i32) {
    %c0_i32 = arith.constant 0 : i32
    %c0_i32_0 = arith.constant 0 : i32
    return %c0_i32, %arg2 : i32, i32
  }
  func.func @transform_2(%arg0: i32, %arg1: i32, %arg2: i32) -> (i32, i32) {
    %c0_i32 = arith.constant 0 : i32
    %c0_i32_0 = arith.constant 0 : i32
    %c0_i32_1 = arith.constant 0 : i32
    return %c0_i32, %c0_i32_0 : i32, i32
  }
  func.func @transform_3(%arg0: i32, %arg1: i32, %arg2: i32) -> (i32, i32) {
    %c0_i32 = arith.constant 0 : i32
    %c0_i32_0 = arith.constant 0 : i32
    return %arg0, %c0_i32 : i32, i32
  }
}

</mosaic_0001>

<bundles_post_ra>
// kernel: tpu_custom_call.1
= control target key start
LH: loop header
LB: loop body
LE: loop exit
PB: predicated region body
PF: predicated region fallthrough
CT: control target
= control target key end

     0   :  { %s766_s0 = inlined_call_operand.hbm [shape: f32[3,8,512], index: 0, kind: input, shape index: {}]   ;;  %s767_s1 = inlined_call_operand.vmem [shape: f32[1,512], index: 1, kind: input, shape index: {}]   ;;  %s768_s2 = inlined_call_operand.<no memory space> [shape: f32[1,1], index: 2, kind: input, shape index: {}]   ;;  %s769_s3 = inlined_call_operand.vmem [shape: f32[8,3], index: 3, kind: output, shape index: {}]  }
   0x1   :  { %8 = sst [smem:[#allocation3]] %s768_s2 }
   0x2   :  { %9 = vsyncpa [#allocation5], 0 }
   0x3   :  { %11 = vsyncpa [#allocation5 + $0x1], 0  ;;  %s621_s14 = smov 0   ;;  %s623_s15 = smov 0  }
   0x4   :  { %s625_s16 = smov 0   ;;  %s627_s17 = smov 0  }
   0x5   :  { %s629_s18 = smov 0   ;;  %s631_s19 = smov 0  }
   0x6 LB: > { %s425_s2 = sadd.s32 4294967295, %s592_s19   ;;  %s32_s20 = sadd.s32 1, %s588_s18  ;;  %s592_s19 = sphi %s631_s19, %s17_s19   ;;  %s588_s18 = sphi %s629_s18, %s779_s18   ;;  %s584_s17 = sphi %s627_s17, %s778_s17   ;;  %s580_s16 = sphi %s625_s16, %s777_s16   ;;  %s576_s15 = sphi %s623_s15, %s776_s15   ;;  %s572_s14 = sphi %s621_s14, %s775_s14  }
   0x7   : > { %p34_p0 = scmp.ge.s32.totalorder %s32_s20, 3  ;;  %s47_s21 = sadd.s32 1, %s580_s16 }
   0x8   : > { %p54_p1 = scmp.ne.s32.totalorder %s580_s16, %s576_s15  ;;  %p55_p2 = scmp.eq.s32.totalorder %s592_s19, 0 }
   0x9   : > { %s781_s20 = smov (%p34_p0, %s32_s20), 0  ;;  %p60_p4 = scmp.ne.s32.totalorder %s576_s15, %s572_s14 }
   0xa   : > { %p657_p3 = por %p55_p2, %p54_p1  ;;  %s40_s23 = ssub.s32 %s588_s18, %s781_s20 }
   0xb   : > { %p61_p5 = scmp.eq.s32.totalorder %s425_s2, 0  ;;  %p45_p6 = scmp.eq.s32.totalorder %s40_s23, 0 }
   0xc   : > { %p449_p8 = scmp.lt.s32.totalorder %s592_s19, 3  ;;  %s168_s26 = sand.u32 1, %s580_s16  }
   0xd   : > { %p664_p7 = por %p61_p5, %p60_p4  ;;  %s440_s27 = sshll.u32 %s588_s18, 9 }
   0xe   : > { %s670_s25 = scalar_select %p45_p6, %s580_s16, %s47_s21  }
   0xf   : > { %s429_s28 = sshll.u32 %s168_s26, 5  ;;  %s677_s4 = scalar_lea.hbm %s766_s0, %s440_s27 }
  0x10   : > { %s172_s5 = scalar_lea.vmem [#allocation4], %s429_s28  ;;  %p681_p9 = pnand %p449_p8, %p657_p3 }
  0x11   : > { %s184_s6 = sshll.u32 %s172_s5, 4  ;;  %s169_s8 = scalar_lea.sflag [#allocation5], %s168_s26  ;;  %s685_s6 = int_to_ptr.vmem [resolvable:$true] %s184_s6 }
  0x12   : > { %s512_s9 = scalar_lea.hbm %s677_s4, 512  ;;  %p514_p13 = pneg %p681_p9 }
  0x13   : > { %p513_p12 = scmp.ne.s32.totalorder %s677_s4, %s512_s9  ;;  %s517_s12 = scalar_lea.hbm %s766_s0, 1536 }
  0x14   : > { %p518_p2 = scmp.lt.u32.totalorder %s677_s4, %s766_s0  ;;  %p519_p3 = scmp.lt.u32.totalorder %s517_s12, %s512_s9 }
  0x15   : > { %p515_p0 = pnand %p514_p13, %p513_p12  ;;  %p521_p5 = scmp.lt.u32.totalorder %s512_s9, %s677_s4 }
  0x16   : > { %p520_p4 = por %p519_p3, %p518_p2 }
  0x17   : > { %p516_p1 = pneg %p515_p0 }
  0x18   : > { %p522_p6 = por %p521_p5, %p520_p4 }
  0x1a   : > { %p523_p8 = pnand %p522_p6, %p516_p1 }
  0x1c   : > { %526 = shalt.err (!%p523_p8)
}
  0x1d   : > { %s527_s2 = scalar_lea.vmem %s685_s6, 512  ;;  %s594_s21 = smov [#allocation4]  }
  0x1e   : > { %p528_p12 = scmp.ne.s32.totalorder %s685_s6, %s527_s2  ;;  %s532_s22 = sshll.u32 %s594_s21, 4  ;;  %s533_s22 = int_to_ptr.vmem [resolvable:$false] %s532_s22 }
  0x1f   : > { %s534_s23 = scalar_lea.vmem %s533_s22, 1024  ;;  %p535_p11 = scmp.lt.s32.totalorder %s685_s6, %s533_s22 }
  0x20   : > { %p530_p0 = pnand %p528_p12, %p514_p13  ;;  %p536_p2 = scmp.lt.s32.totalorder %s534_s23, %s527_s2 }
  0x22   : > { %p531_p10 = pneg %p530_p0  ;;  %p537_p3 = por %p536_p2, %p535_p11 }
  0x24   : > { %p538_p4 = pnand %p537_p3, %p531_p10 }
  0x26   : > { %541 = shalt.err (!%p538_p4)
}
  0x27   : > { %448 = dma.hbm_to_vmem [thread:$0]  (!%p681_p9), %s677_s4, 512, %s685_s6, %s169_s8  }
  0x28   : > { %p773_p1 = scmp.lt.s32.totalorder %s592_s19, 4  ;;  %p774_p5 = scmp.ge.s32.totalorder %s592_s19, 1 }
  0x2a   : > { %p190_p13 = pnand %p774_p5, %p773_p1 }
  0x2b   : > { %s195_s26 = sand.u32 (!%p190_p13), 1, %s576_s15  }
  0x2c   : > { %193 = sbr.rel (%p190_p13) target bundleno = 724 (0x2d4), region = 32  ;;  %s433_s27 = sshll.u32 (!%p190_p13), %s195_s26, 5 }
  0x2d   : > { %s196_s28 = scalar_lea.sflag (!%p190_p13), [#allocation5], %s195_s26  ;;  %s199_s29 = scalar_lea.vmem (!%p190_p13), [#allocation4], %s433_s27 }
  0x33   : > { %567 = dma.done.wait (%p664_p7), %s196_s28, 512  }
  0x34   : > { %569 = vsyncadd (%p664_p7), %s196_s28, 4294966784  ;;  %p235_p10 = scmp.eq.s32.totalorder %s584_s17, 0 }
  0x35   : > { %vm241_vm0 = vcmask (%p235_p10), 23552   ;;  %v595_v0 = vmov (%p235_p10), 0.0  }
  0x36   : > { %240 = sbr.rel (!%p235_p10) target bundleno = 61 (0x3d), region = 40  ;;  %242 = vst.msk [vmem:[%s769_s3] sm:$0xff] (%p235_p10), %vm241_vm0, %v595_v0 }
  0x3d PF: > { %v255_v1 = vlaneseq  ;;  %v253_v3 = vld [vmem:[%s767_s1] sm:$0xf]  ;;  %v249_v8 = vld [vmem:[%s199_s29] sm:$0xff]  ;;  %v250_v9 = vld [vmem:[%s199_s29 + $0x8] sm:$0xff]  ;;  %vm246_vm1 = vcmask 7168   ;;  %v596_v23 = vmov 0.0   ;;  %v305_v39 = vstv %s584_s17 }
  0x3e   : > { %v251_v10 = vld [vmem:[%s199_s29 + $0x10] sm:$0xff]  ;;  %v252_v15 = vld [vmem:[%s199_s29 + $0x18] sm:$0xff]  ;;  %247 = vst.msk [vmem:[#allocation2] sm:$0xff] %vm246_vm1, %v596_v23  ;;  %v597_v24 = vmov 0   ;;  %s291_s24 = sld [smem:[#allocation3]]  ;;  %p316_p7 = scmp.eq.s32.totalorder %s584_s17, 2 }
  0x3f   : > { %v256_v2 = vshrl.u32 %v255_v1, 7  ;;  %501 = vset.pattern.permute.xlu0 %v597_v24  ;;  %v304_v38 = vand.u32 127, %v255_v1  ;;  %v307_v40 = vld [vmem:[%s769_s3] sm:$0xff]  ;;  %vm314_vm3 = vcmask 23552  }
  0x41   : > { %v257_v4 = vsub.s32 0, %v256_v2  ;;  %v261_v5 = vsub.s32 1, %v256_v2  ;;  %v265_v6 = vsub.s32 2, %v256_v2  ;;  %v269_v7 = vsub.s32 3, %v256_v2 }
  0x42   : > { %vm306_vm2 = vcmp.eq.s32.totalorder %v304_v38, %v305_v39 }
  0x43   : > { %v258_v11 = vrot.slane %v253_v3, %v257_v4  ;;  %v262_v12 = vrot.slane %v253_v3, %v261_v5  ;;  %v266_v13 = vrot.slane %v253_v3, %v265_v6  ;;  %v270_v14 = vrot.slane %v253_v3, %v269_v7 }
  0x44   : > { %v292_v28 = vstv %s291_s24 }
  0x45   : > { %v275_v16 = vmul.f32 %v258_v11, %v249_v8  ;;  %v276_v17 = vmul.f32 %v262_v12, %v250_v9  ;;  %v277_v18 = vmul.f32 %v266_v13, %v251_v10  ;;  %v278_v19 = vmul.f32 %v270_v14, %v252_v15  ;;  %v248_v25 = vld [vmem:[#allocation2] sm:$0xff] }
  0x47   : > { %v279_v20 = vadd.f32 %v276_v17, %v275_v16 }
  0x49   : > { %v280_v21 = vadd.f32 %v279_v20, %v277_v18 }
  0x4b   : > { %v281_v22 = vadd.f32 %v280_v21, %v278_v19 }
  0x4d   : > { %282 = vadd.xlane.f32.xlu0 %v281_v22 }
  0xda   : > { %v283_v26 = vpop.xlane.xlu0 %282 }
  0xdb   : > { %v284_v27 = vadd.f32 %v283_v26, %v248_v25 }
  0xdd   : > { %286 = vst.msk [vmem:[#allocation2] sm:$0xff] %vm246_vm1, %v284_v27 }
  0xe4   : > { %v290_v29 = vld [vmem:[#allocation2] sm:$0xff] }
  0xe5   : > { %v293_v30 = vadd.f32 %v292_v28, %v290_v29 }
  0xe7   : > { %v294_v31 = vand.u32 2147483647, %v293_v30 }
  0xe9   : > { %502 = vlog2.f32 %v294_v31 }
  0xf3   : > { %v503_v32 = vpop.eup %502 }
  0xf4   : > { %v435_v33 = vmul.f32 -0.6931472, %v503_v32 }
  0xf6   : > { %v298_v34 = vmul.f32 1.442695, %v435_v33 }
  0xf8   : > { %504 = vpow2.f32 %v298_v34 }
 0x102   : > { %v505_v35 = vpop.eup %504 }
 0x103   : > { %v300_v36 = vadd.f32 1.0, %v505_v35 }
 0x105   : > { %506 = vrcp.f32 %v300_v36 }
 0x10f   : > { %v507_v37 = vpop.eup %506 }
 0x110   : > { %310 = vperm.xlu0 %501, %v507_v37  }
 0x18b   : > { %320 = sbr.rel (!%p316_p7) target bundleno = 724 (0x2d4), region = 52 }
 0x18f   : > { %v311_v41 = vpop.permute.xlu0 %310 }
 0x190   : > { %v313_v42 = vsel %vm306_vm2, %v311_v41, %v307_v40 }
 0x191   : > { %315 = vst.msk [vmem:[%s769_s3] sm:$0xff] %vm314_vm3, %v313_v42 }
 0x198   : > { %v321_v43 = vld [vmem:[%s769_s3] sm:$0xff] }
 0x199   : > { %v323_v44 = vsel %vm314_vm3, %v321_v43, -inf }
 0x19a   : > { %324 = vmax.xlane.f32.xlu0 %v323_v44 }
 0x227   : > { %v325_v45 = vpop.xlane.xlu0 %324 }
 0x228   : > { %v326_v46 = vsub.f32 %v321_v43, %v325_v45 }
 0x22a   : > { %v327_v47 = vmul.f32 1.442695, %v326_v46 }
 0x22c   : > { %508 = vpow2.f32 %v327_v47 }
 0x236   : > { %v509_v48 = vpop.eup %508 }
 0x237   : > { %v329_v49 = vsel %vm314_vm3, %v509_v48, 0.0 }
 0x238   : > { %330 = vadd.xlane.f32.xlu0 %v329_v49 }
 0x2c5   : > { %v331_v50 = vpop.xlane.xlu0 %330 }
 0x2c6   : > { %510 = vrcp.f32 %v331_v50 }
 0x2d0   : > { %v511_v51 = vpop.eup %510 }
 0x2d1   : > { %v333_v52 = vmul.f32 %v511_v51, %v509_v48 }
 0x2d3   : > { %334 = vst.msk [vmem:[%s769_s3] sm:$0xff] %vm314_vm3, %v333_v52 }
 0x2d4 PF: > { %s17_s19 = sadd.s32 1, %s592_s19   ;;  %s775_s14 = smov %s576_s15 }
 0x2d5   : > { %p14_p9 = scmp.ge.s32.totalorder %s17_s19, 5   ;;  %s776_s15 = smov %s580_s16 }
 0x2d6   : > { %s777_s16 = smov %s670_s25  ;;  %s778_s17 = smov %s588_s18 }
 0x2d7   : > { %s779_s18 = smov %s781_s20  ;;  %16 = sbr.rel (!%p14_p9) target bundleno = 6 (0x6), region = 91 }
 0x2de   :  { %354 = vsyncpa [#allocation5], 1 }
 0x2df   :  { %356 = vsyncpa [#allocation5 + $0x1], 1 }

</bundles_post_ra>
